<compile_context>
chip_gen: v5e
topology: v5e:2x2
jax: 0.10.0
libtpu: 0.0.40
codegen_flags: <defaults>
</compile_context>

<pallas_src>
import jax
import jax.numpy as jnp
from jax.experimental import pallas as pl
from jax.experimental.pallas import tpu as pltpu

f32 = jnp.float32

# ---- small hyper-params consistent with the module's __init__ -------------
N        = 2     # batch
T_ENC    = 8     # max text length
VOCAB    = 32    # args.vocab_size
CHARVEC  = 32    # args.charvec_dim
ENC_H    = 32    # args.enc_hidden (== att_hidden == gst dim)
SPKR_E   = 16    # args.spkr_embed_size
NUM_ID   = 4     # args.num_id
DEC_H    = 32    # args.dec_hidden (prenet width of the decoder stand-in)
DEC_OUT  = 120   # args.dec_out_size (hard-coded 120 in the inference loop)
R_FACTOR = 2     # args.r_factor
POST_H   = 32    # common_hidden used by the post processor
ACC_H    = 32    # accent_layer: nn.Linear(1, 32)

# padded / tiling constants
DEC_PAD   = 128                     # 120 -> 128 (lane-aligned frame width)
OUT_PAD   = R_FACTOR * DEC_PAD      # 240 -> 256 (lane-aligned r*frame width)
TBLK      = 128                     # decoder-time block (static proj / decoder)


def _full_vmem():
    return pl.BlockSpec(memory_space=pltpu.MemorySpace.VMEM)


# ---------------------------------------------------------------------------
# Kernel 1: fused encoder stand-in + accent layer + GST add + duration pred
#           + w_ceil (round(clamp(dur*mask*speed_x, min=1))).
# TODO(synk): real Encoder (CBHG/conv stack) and DurationPredictor (3-layer
#             conv) are not provided in the file — dense stand-ins.
# ---------------------------------------------------------------------------
def encoder_dur_kernel(ph_ref, acc_ref, gst_ref, wa_ref, ba_ref,
                       w1_ref, w2_ref, be_ref, wd_ref, bd_ref, speed_ref,
                       masksx_ref,
                       enc_out_ref, dur_out_ref, wceil_ref):
    ph = ph_ref[...]                                    # (N, T, C)
    acc = acc_ref[...]                                  # (N, T)
    # accent_layer: Linear(1, 32) + ReLU
    a_proj = jnp.maximum(acc[:, :, None] * wa_ref[...][None]
                         + ba_ref[...][None], 0.0)      # (N, T, ACC_H)
    n, t, c = ph.shape
    h = jnp.dot(ph.reshape(n * t, c), w1_ref[...], preferred_element_type=f32)
    h = h + jnp.dot(a_proj.reshape(n * t, ACC_H), w2_ref[...],
                    preferred_element_type=f32)
    h = jnp.tanh(h + be_ref[...])
    enc_gst = h.reshape(n, t, ENC_H) + gst_ref[...]     # + gst (N, 1, H)
    enc_out_ref[...] = enc_gst

    d = jnp.sum(enc_gst * wd_ref[...][None], axis=-1)   # (N, T)
    d = 1.0 + jnp.maximum(d + bd_ref[...], 0.0)
    dur = d / speed_ref[...]                            # speed (N, 1) broadcast
    dur_out_ref[...] = dur
    # fused: w = dur * text_mask * speed_x ; w_ceil = round(clamp(w, min=1))
    w = dur * masksx_ref[...]
    wceil_ref[...] = jnp.round(jnp.maximum(w, 1.0))


# ---------------------------------------------------------------------------
# Kernel 2: hoisted (non-recurrent) decoder terms, tiled over decoder time.
# Fully parallel: the cumsum carry for each 128-step block is PRECOMPUTED in
# the wrapper (exclusive prefix of per-block attention sums) and passed in.
# Attention is consumed in its natural (N, T_enc, T_dec) layout (time on
# lanes → lane-dense DMA); a single tiny (8,128)->(128,8) transpose per batch
# element restores the time-on-sublanes orientation for the projections.
# Per 128-step block and per batch element:
#   cs  = block-local cumsum (128x128 tri matmul) + carried prefix,
#   pos = sum_e (cs / cumsum_last) * att,
#   ctx = att^T @ enc_with_gst,
#   y   = ctx @ Wco + pos * Wqo + spkr @ Wso + b   (lane-padded 256)
# ---------------------------------------------------------------------------
def static_proj_kernel(att_ref, carry_ref, dinv_ref, enc_ref, spkr_ref,
                       wco_ref, wso_ref, wqo_ref, bo_ref, out_ref):
    att = att_ref[...]                    # (N, E, TBLK)  time on lanes
    carry = carry_ref[0]                  # (N, E)        sum of all previous blocks
    dinv = dinv_ref[...]                  # (N, E)        1 / att_cumsum[:, :, -1]
    enc = enc_ref[...]                    # (N, E, H)
    wco = wco_ref[...]                    # (H, OUT_PAD)
    wqo = wqo_ref[...]                    # (1, OUT_PAD)
    bo = bo_ref[...]                      # (1, OUT_PAD)
    spk_term = jnp.dot(spkr_ref[...], wso_ref[...],
                       preferred_element_type=f32)        # (N, OUT_PAD)

    tblk = att.shape[-1]
    row = jax.lax.broadcasted_iota(jnp.int32, (tblk, tblk), 0)
    col = jax.lax.broadcasted_iota(jnp.int32, (tblk, tblk), 1)
    ltri = (col <= row).astype(f32)       # block-local cumsum operator (sum t' <= t)
    # NOTE: keep TBLK=128 here — the (128,128) operator is already 16 vregs.

    for b in range(att.shape[0]):         # N is tiny & static
        at = att[b].T                                          # (TBLK, E)
        cs = jnp.dot(ltri, at, preferred_element_type=f32) + carry[b:b + 1, :]
        pos = jnp.sum(cs * dinv[b:b + 1, :] * at,
                      axis=1, keepdims=True)                   # (TBLK, 1)
        ctx = jnp.dot(at, enc[b], preferred_element_type=f32)  # (TBLK, H)
        y = (jnp.dot(ctx, wco, preferred_element_type=f32)
             + pos * wqo + spk_term[b:b + 1, :] + bo)          # (TBLK, OUT_PAD)
        out_ref[b] = y


# ---------------------------------------------------------------------------
# Kernel 3: autoregressive decoder.  The serial recurrence is reduced to
#   pre_{t+1} = relu(pre_t @ Wrec + Srec_t)         (one (N,32)@(32,32) / step)
# where Srec is computed once per block from the resident static tile; the
# per-step pre vectors are stashed in a VMEM scratch and ALL wide outputs of
# the block are produced after the loop with dense matmuls + dense stores.
# The grid walks 128-step blocks; pre is carried across blocks in VMEM.
# TODO(synk): real DecoderRNN (prenet + attention-RNN + LSTM stack) is not
#             provided — prenet + linear output stand-in.
# ---------------------------------------------------------------------------
def decoder_loop_kernel(static_ref, wpre_ref, bpre_ref, wpo_ref, wrec_ref,
                        out_ref, pre_carry_ref, pre_store_ref, srec_ref):
    n, tblk, _ = static_ref.shape

    @pl.when(pl.program_id(0) == 0)
    def _():
        # step 0 uses prev = zeros(N,1,120) as in the PyTorch inference loop,
        # hence pre_0 = relu(0 @ Wpre + bpre) = relu(bpre)
        pre_carry_ref[...] = jnp.maximum(
            jnp.broadcast_to(bpre_ref[...], pre_carry_ref.shape), 0.0)

    # per-block recurrent bias: Srec[b,t,:] = static[b,t,128:] @ Wpre + bpre
    # (off the serial path; one (128,128)@(128,32) matmul per batch element)
    for b in range(n):
        srec_ref[b] = (jnp.dot(static_ref[b, :, DEC_PAD:], wpre_ref[...],
                               preferred_element_type=f32) + bpre_ref[...])

    wrec = wrec_ref[...]                  # (DEC_H, DEC_H)

    def step(t, pre):                     # pre: (N, DEC_H) prenet activation
        pre_store_ref[:, t, :] = pre
        s = srec_ref[:, t, :]             # (N, DEC_H)
        return jnp.maximum(jnp.dot(pre, wrec, preferred_element_type=f32) + s,
                           0.0)

    pre_carry_ref[...] = jax.lax.fori_loop(0, tblk, step, pre_carry_ref[...],
                                           unroll=8)

    # dense post-loop pass: y[t] = pre[t] @ Wpo + static[t] for the whole block
    # (split per batch element / per 128-lane frame half to bound vreg usage).
    for b in range(n):
        pre_b = pre_store_ref[b]          # (TBLK, DEC_H)
        for r in range(R_FACTOR):
            cols = slice(r * DEC_PAD, (r + 1) * DEC_PAD)
            out_ref[b, :, cols] = (
                jnp.dot(pre_b, wpo_ref[:, cols], preferred_element_type=f32)
                + static_ref[b, :, cols])


# ---------------------------------------------------------------------------
# Kernel 4: post processor (+ residual add, + frame mask), tiled over time.
# TODO(synk): real ConvPostProcessor is a conv stack (not provided) — per-frame
#             2-layer MLP stand-in; residual add fused into the kernel.
# ---------------------------------------------------------------------------
def post_kernel(x_ref, m_ref, w1_ref, b1_ref, w2_ref, b2_ref, out_ref):
    x = x_ref[...]                                      # (N, TILE, DEC_PAD)
    n, t, d = x.shape
    x2 = x.reshape(n * t, d)
    h = jnp.tanh(jnp.dot(x2, w1_ref[...], preferred_element_type=f32)
                 + b1_ref[...])
    p = jnp.dot(h, w2_ref[...], preferred_element_type=f32) + b2_ref[...]
    # NOTE: residual x is added unmasked in the padded tail; it is stripped
    # before returning, matching the previous version.
    out_ref[...] = p.reshape(n, t, d) * m_ref[...][:, :, None] + x


# ---------------------------------------------------------------------------
# plain-JAX glue: generate_path (glow-tts style) and weight padding helpers
# ---------------------------------------------------------------------------
def generate_path(duration, mask):
    # duration: (N, T_enc), mask: (N, T_enc, T_dec)
    cum = jnp.cumsum(duration, axis=-1)
    t_dec = mask.shape[-1]
    t = jnp.arange(t_dec, dtype=duration.dtype)
    path = (t[None, None, :] < cum[:, :, None]).astype(f32)
    path = path - jnp.pad(path, ((0, 0), (1, 0), (0, 0)))[:, :-1]
    return path * mask


def _pad_frame_cols(w):
    """(..., R*DEC_OUT) -> (..., R*DEC_PAD): frame f occupies [f*128, f*128+120)."""
    out = jnp.zeros(w.shape[:-1] + (OUT_PAD,), f32)
    for r in range(R_FACTOR):
        out = out.at[..., r * DEC_PAD:r * DEC_PAD + DEC_OUT].set(
            w[..., r * DEC_OUT:(r + 1) * DEC_OUT])
    return out


# ---------------------------------------------------------------------------
# deterministic parameter construction (logical / unpadded shapes)
# ---------------------------------------------------------------------------
def init_params(key):
    ks = jax.random.split(key, 20)
    nrm = lambda k, s, sc: (jax.random.normal(k, s, dtype=f32) * sc)
    return {
        "spkr_embed": nrm(ks[0], (NUM_ID, SPKR_E), 0.3),   # nn.Embedding(num_id, spkr_embed_size)
        "phone_embed": nrm(ks[1], (VOCAB, CHARVEC), 0.3),  # encoder char embedding
        "acc_w": nrm(ks[2], (1, ACC_H), 0.1),              # accent_layer Linear(1,32)
        "acc_b": nrm(ks[3], (1, ACC_H), 0.01),
        "enc_w1": nrm(ks[4], (CHARVEC, ENC_H), 0.1),
        "enc_w2": nrm(ks[5], (ACC_H, ENC_H), 0.1),
        "enc_b": nrm(ks[6], (1, ENC_H), 0.01),
        "dur_w": nrm(ks[7], (1, ENC_H), 0.1),
        "dur_b": nrm(ks[8], (1, 1), 0.01),
        "pre_w": nrm(ks[9], (DEC_OUT, DEC_H), 0.1),
        "pre_b": nrm(ks[10], (1, DEC_H), 0.01),
        "out_wpre": nrm(ks[11], (DEC_H, R_FACTOR * DEC_OUT), 0.1),
        "out_wctx": nrm(ks[12], (ENC_H, R_FACTOR * DEC_OUT), 0.1),
        "out_wspk": nrm(ks[13], (SPKR_E, R_FACTOR * DEC_OUT), 0.1),
        "out_wpos": nrm(ks[14], (1, R_FACTOR * DEC_OUT), 0.1),
        "out_b": nrm(ks[15], (1, R_FACTOR * DEC_OUT), 0.01),
        "post_w1": nrm(ks[16], (DEC_OUT, POST_H), 0.1),
        "post_b1": nrm(ks[17], (1, POST_H), 0.01),
        "post_w2": nrm(ks[18], (POST_H, DEC_OUT), 0.1),
        "post_b2": nrm(ks[19], (1, DEC_OUT), 0.01),
        # ProsodyStatsGST buffers (speed per speaker)
        "prosody_speed": jnp.full((NUM_ID, 1), 0.5, dtype=f32),
    }


# ---------------------------------------------------------------------------
# top-level forward (inference / synthesis path, gst_source='cluster')
# ---------------------------------------------------------------------------
def tacotron_forward(params, enc_input, spkr_id, spec_lengths, text_lengths,
                     accents, gst_vec, speed_x=1.0):
    p = params
    n, t_enc = enc_input.shape

    spec_lengths_r = spec_lengths // R_FACTOR
    text_mask_f = (jnp.arange(t_enc)[None, :]
                   < text_lengths[:, None]).astype(f32)

    # --- lane-aligned (zero-padded) weight layouts: 120->128, 240->256 -------
    wpre_p = jnp.zeros((DEC_PAD, DEC_H), f32).at[:DEC_OUT].set(p["pre_w"])
    wpo_p = _pad_frame_cols(p["out_wpre"])
    wco_p = _pad_frame_cols(p["out_wctx"])
    wso_p = _pad_frame_cols(p["out_wspk"])
    wqo_p = _pad_frame_cols(p["out_wpos"])
    bo_p = _pad_frame_cols(p["out_b"])
    post_w1_p = jnp.zeros((DEC_PAD, POST_H), f32).at[:DEC_OUT].set(p["post_w1"])
    post_w2_p = jnp.zeros((POST_H, DEC_PAD), f32).at[:, :DEC_OUT].set(p["post_w2"])
    post_b2_p = jnp.zeros((1, DEC_PAD), f32).at[:, :DEC_OUT].set(p["post_b2"])

    # Algebraic shortening of the serial decoder recurrence:
    #   prev_{t+1} = y_t[:, 128:]  and  pre_{t+1} = relu(prev_{t+1} @ Wpre + b)
    #   => pre_{t+1} = relu(pre_t @ Wrec + static_t[:,128:] @ Wpre + b)
    wrec = jnp.dot(wpo_p[:, DEC_PAD:], wpre_p)               # (DEC_H, DEC_H)

    # speaker embedding  (TODO(synk): max_norm=2 re-norm of nn.Embedding skipped)
    spkr_vec2 = p["spkr_embed"][spkr_id]                     # (N, SPKR_E)

    # speed from prosody stats (inference, not ref_wav)
    speed = p["prosody_speed"][spkr_id] / speed_x            # (N, 1)

    ph_emb = p["phone_embed"][enc_input]                     # (N, T_enc, CHARVEC)
    gst_vec3 = gst_vec.reshape(n, 1, ENC_H)                  # gst_source='cluster'
    mask_sx = text_mask_f * speed_x                          # fused mask*speed_x

    # fused encoder + GST add + duration predictor + w_ceil (one launch)
    enc_with_gst, dur, w_ceil = pl.pallas_call(
        encoder_dur_kernel,
        out_shape=(jax.ShapeDtypeStruct((n, t_enc, ENC_H), f32),
                   jax.ShapeDtypeStruct((n, t_enc), f32),
                   jax.ShapeDtypeStruct((n, t_enc), f32)),
        in_specs=[_full_vmem() for _ in range(12)],
        out_specs=(_full_vmem(), _full_vmem(), _full_vmem()),
    )(ph_emb, accents, gst_vec3, p["acc_w"], p["acc_b"],
      p["enc_w1"], p["enc_w2"], p["enc_b"],
      p["dur_w"], p["dur_b"], speed, mask_sx)

    duration_pred = dur[:, None, :]                          # (N, 1, T_enc)

    # Single host sync (same cost as the reference's .item()); bucket T to a
    # multiple of TBLK so every pallas_call has static, lane-aligned shapes
    # and compiles once per bucket instead of once per utterance length.
    # (Whole-tensor sum over both batch elements is faithful to the reference.)
    T_dec = max(int(jnp.sum(w_ceil)), 1)
    T_pad = ((T_dec + TBLK - 1) // TBLK) * TBLK
    n_blocks = T_pad // TBLK

    attention_mask = jnp.broadcast_to(text_mask_f[:, :, None],
                                      (n, t_enc, T_pad))
    attention_ref = generate_path(w_ceil, attention_mask)    # (N, E, T_pad)

    # att_cumsum[:, :, -1] == total duration per phoneme row; guard 0-rows
    # (PyTorch would produce NaN here for fully-masked phoneme rows).
    denom = jnp.sum(attention_ref, axis=-1)                  # (N, E)
    denom_inv = jnp.where(denom > 0.0, 1.0 / jnp.maximum(denom, 1e-9), 0.0)

    # precomputed exclusive per-block cumsum carry → static_proj is 'parallel'
    block_sums = attention_ref.reshape(n, t_enc, n_blocks, TBLK).sum(axis=-1)
    carry_blocks = jnp.moveaxis(jnp.cumsum(block_sums, axis=-1) - block_sums,
                                -1, 0)                       # (n_blocks, N, E)

    # hoisted non-recurrent decoder terms (cumsum/position/context/projections)
    static_y = pl.pallas_call(
        static_proj_kernel,
        grid=(n_blocks,),
        in_specs=[
            pl.BlockSpec((n, t_enc, TBLK), lambda j: (0, 0, j)),
            pl.BlockSpec((1, n, t_enc), lambda j: (j, 0, 0)),
            pl.BlockSpec((n, t_enc), lambda j: (0, 0)),
            pl.BlockSpec((n, t_enc, ENC_H), lambda j: (0, 0, 0)),
            pl.BlockSpec((n, SPKR_E), lambda j: (0, 0)),
            pl.BlockSpec((ENC_H, OUT_PAD), lambda j: (0, 0)),
            pl.BlockSpec((SPKR_E, OUT_PAD), lambda j: (0, 0)),
            pl.BlockSpec((1, OUT_PAD), lambda j: (0, 0)),
            pl.BlockSpec((1, OUT_PAD), lambda j: (0, 0)),
        ],
        out_specs=pl.BlockSpec((n, TBLK, OUT_PAD), lambda j: (0, j, 0)),
        out_shape=jax.ShapeDtypeStruct((n, T_pad, OUT_PAD), f32),
        compiler_params=pltpu.CompilerParams(
            dimension_semantics=("parallel",)),   # no carry → megacore-friendly
    )(attention_ref, carry_blocks, denom_inv, enc_with_gst, spkr_vec2,
      wco_p, wso_p, wqo_p, bo_p)

    # autoregressive decoder: serial path carries only pre @ Wrec (32x32)
    dec_raw = pl.pallas_call(
        decoder_loop_kernel,
        grid=(n_blocks,),
        in_specs=[
            pl.BlockSpec((n, TBLK, OUT_PAD), lambda j: (0, j, 0)),
            pl.BlockSpec((DEC_PAD, DEC_H), lambda j: (0, 0)),
            pl.BlockSpec((1, DEC_H), lambda j: (0, 0)),
            pl.BlockSpec((DEC_H, OUT_PAD), lambda j: (0, 0)),
            pl.BlockSpec((DEC_H, DEC_H), lambda j: (0, 0)),
        ],
        out_specs=pl.BlockSpec((n, TBLK, OUT_PAD), lambda j: (0, j, 0)),
        out_shape=jax.ShapeDtypeStruct((n, T_pad, OUT_PAD), f32),
        scratch_shapes=[pltpu.VMEM((n, DEC_H), f32),          # pre carry
                        pltpu.VMEM((n, TBLK, DEC_H), f32),    # per-step pre store
                        pltpu.VMEM((n, TBLK, DEC_H), f32)],   # per-block Srec
        compiler_params=pltpu.CompilerParams(
            dimension_semantics=("arbitrary",)),   # recurrence across blocks
    )(static_y, wpre_p, p["pre_b"], wpo_p, wrec)

    # (N, T_pad, 2*128) -> (N, T_pad*2, 128): contiguous (free) reshape — this
    # is torch.cat(output_dec_list, dim=1) in frame-major form, no transpose.
    T_frames = T_dec * R_FACTOR
    T_frames_pad = T_pad * R_FACTOR
    dec_frames = dec_raw.reshape(n, T_frames_pad, DEC_PAD)

    # TODO(synk): PyTorch passes spec_mask built from spec_lengths, which
    # mismatches the generated length at inference; mask the generated frames.
    frame_mask = jnp.broadcast_to(
        (jnp.arange(T_frames_pad) < T_frames).astype(f32)[None, :],
        (n, T_frames_pad))

    # adaptive post tile: as large as possible while keeping >= 2 grid blocks
    post_tblk = 256
    for cand in (1024, 512):
        if T_frames_pad % cand == 0 and T_frames_pad // cand >= 2:
            post_tblk = cand
            break

    # post processor + residual, tiled over time ('parallel' axis)
    post_pad = pl.pallas_call(
        post_kernel,
        grid=(T_frames_pad // post_tblk,),
        in_specs=[
            pl.BlockSpec((n, post_tblk, DEC_PAD), lambda j: (0, j, 0)),
            pl.BlockSpec((n, post_tblk), lambda j: (0, j)),
            pl.BlockSpec((DEC_PAD, POST_H), lambda j: (0, 0)),
            pl.BlockSpec((1, POST_H), lambda j: (0, 0)),
            pl.BlockSpec((POST_H, DEC_PAD), lambda j: (0, 0)),
            pl.BlockSpec((1, DEC_PAD), lambda j: (0, 0)),
        ],
        out_specs=pl.BlockSpec((n, post_tblk, DEC_PAD), lambda j: (0, j, 0)),
        out_shape=jax.ShapeDtypeStruct((n, T_frames_pad, DEC_PAD), f32),
        compiler_params=pltpu.CompilerParams(
            dimension_semantics=("parallel",)),
    )(dec_frames, frame_mask, post_w1_p, p["post_b1"], post_w2_p, post_b2_p)

    # strip time padding and the 120->128 channel padding
    output_dec = dec_frames[:, :T_frames, :DEC_OUT]
    output_post = post_pad[:, :T_frames, :DEC_OUT]

    return {
        "output_dec": output_dec,
        "output_post": output_post,
        "gst_vec": gst_vec3,
        "seq_end": spec_lengths_r,
        "att_weights": attention_ref[:, :, :T_dec],
        "duration_pred": duration_pred,
    }


if __name__ == "__main__":
    key = jax.random.PRNGKey(0)
    kp, k1, k2, k3, k4 = jax.random.split(key, 5)

    params = init_params(kp)

    enc_input = jax.random.randint(k1, (N, T_ENC), 0, VOCAB, dtype=jnp.int32)
    spkr_id = jnp.array([1, 3], dtype=jnp.int32)
    accents = jax.random.uniform(k2, (N, T_ENC), dtype=f32)
    gst_vec = jax.random.normal(k3, (N, ENC_H), dtype=f32) * 0.3  # gst_source='cluster'
    text_lengths = jnp.array([T_ENC, T_ENC - 2], dtype=jnp.int32)
    spec_lengths = jnp.array([12, 10], dtype=jnp.int32)

    out = tacotron_forward(params, enc_input, spkr_id, spec_lengths,
                           text_lengths, accents, gst_vec, speed_x=1.0)
    jax.block_until_ready(out)

    assert out["output_dec"].shape[0] == N and out["output_dec"].shape[2] == DEC_OUT
    assert out["output_dec"].shape[1] % R_FACTOR == 0
    assert out["output_post"].shape == out["output_dec"].shape
    assert bool(jnp.all(jnp.isfinite(out["output_post"])))
    print("KERNEL_OK")
</pallas_src>

<mosaic_0001>
module attributes {stable_mosaic.version = 11 : i64} {
  func.func @encoder_dur_kernel(%arg0: memref<2x8x32xf32, #tpu.memory_space<vmem>>, %arg1: memref<2x8xf32, #tpu.memory_space<vmem>>, %arg2: memref<2x1x32xf32, #tpu.memory_space<vmem>>, %arg3: memref<1x32xf32, #tpu.memory_space<vmem>>, %arg4: memref<1x32xf32, #tpu.memory_space<vmem>>, %arg5: memref<32x32xf32, #tpu.memory_space<vmem>>, %arg6: memref<32x32xf32, #tpu.memory_space<vmem>>, %arg7: memref<1x32xf32, #tpu.memory_space<vmem>>, %arg8: memref<1x32xf32, #tpu.memory_space<vmem>>, %arg9: memref<1x1xf32, #tpu.memory_space<vmem>>, %arg10: memref<2x1xf32, #tpu.memory_space<vmem>>, %arg11: memref<2x8xf32, #tpu.memory_space<vmem>>, %arg12: memref<2x8x32xf32, #tpu.memory_space<vmem>>, %arg13: memref<2x8xf32, #tpu.memory_space<vmem>>, %arg14: memref<2x8xf32, #tpu.memory_space<vmem>>) attributes {dimension_semantics = [], scalar_prefetch = 0 : i64, scratch_operands = 0 : i64, tpu.core_type = #tpu.core_type<tc>} {
    %c0 = arith.constant 0 : index
    %c0_0 = arith.constant 0 : index
    %c0_1 = arith.constant 0 : index
    %0 = vector.load %arg0[%c0, %c0_0, %c0_1] : memref<2x8x32xf32, #tpu.memory_space<vmem>>, vector<2x8x32xf32>
    %c0_2 = arith.constant 0 : index
    %c0_3 = arith.constant 0 : index
    %1 = vector.load %arg1[%c0_2, %c0_3] : memref<2x8xf32, #tpu.memory_space<vmem>>, vector<2x8xf32>
    %2 = vector.shape_cast %1 : vector<2x8xf32> to vector<2x8x1xf32>
    %c0_4 = arith.constant 0 : index
    %c0_5 = arith.constant 0 : index
    %3 = vector.load %arg3[%c0_4, %c0_5] : memref<1x32xf32, #tpu.memory_space<vmem>>, vector<1x32xf32>
    %4 = vector.shape_cast %3 : vector<1x32xf32> to vector<1x1x32xf32>
    %5 = vector.broadcast %2 : vector<2x8x1xf32> to vector<2x8x32xf32>
    %6 = vector.broadcast %4 : vector<1x1x32xf32> to vector<2x8x32xf32>
    %7 = arith.mulf %5, %6 : vector<2x8x32xf32>
    %c0_6 = arith.constant 0 : index
    %c0_7 = arith.constant 0 : index
    %8 = vector.load %arg4[%c0_6, %c0_7] : memref<1x32xf32, #tpu.memory_space<vmem>>, vector<1x32xf32>
    %9 = vector.shape_cast %8 : vector<1x32xf32> to vector<1x1x32xf32>
    %10 = vector.broadcast %9 : vector<1x1x32xf32> to vector<2x8x32xf32>
    %11 = arith.addf %7, %10 : vector<2x8x32xf32>
    %cst = arith.constant 0.000000e+00 : f32
    %12 = vector.broadcast %cst : f32 to vector<2x8x32xf32>
    %13 = arith.maximumf %11, %12 : vector<2x8x32xf32>
    %14 = vector.shape_cast %0 : vector<2x8x32xf32> to vector<16x32xf32>
    %c0_8 = arith.constant 0 : index
    %c0_9 = arith.constant 0 : index
    %15 = vector.load %arg5[%c0_8, %c0_9] : memref<32x32xf32, #tpu.memory_space<vmem>>, vector<32x32xf32>
    %cst_10 = arith.constant dense<0.000000e+00> : vector<16x32xf32>
    %16 = tpu.matmul %14, %15, %cst_10 {dimension_numbers = #tpu.dot_dimension_numbers<[1], [0], [0], [1], [0, 0, 1, 1], [], []>} : vector<16x32xf32>, vector<32x32xf32>, vector<16x32xf32> -> vector<16x32xf32>
    %17 = vector.shape_cast %13 : vector<2x8x32xf32> to vector<16x32xf32>
    %c0_11 = arith.constant 0 : index
    %c0_12 = arith.constant 0 : index
    %18 = vector.load %arg6[%c0_11, %c0_12] : memref<32x32xf32, #tpu.memory_space<vmem>>, vector<32x32xf32>
    %cst_13 = arith.constant dense<0.000000e+00> : vector<16x32xf32>
    %19 = tpu.matmul %17, %18, %cst_13 {dimension_numbers = #tpu.dot_dimension_numbers<[1], [0], [0], [1], [0, 0, 1, 1], [], []>} : vector<16x32xf32>, vector<32x32xf32>, vector<16x32xf32> -> vector<16x32xf32>
    %20 = arith.addf %16, %19 : vector<16x32xf32>
    %c0_14 = arith.constant 0 : index
    %c0_15 = arith.constant 0 : index
    %21 = vector.load %arg7[%c0_14, %c0_15] : memref<1x32xf32, #tpu.memory_space<vmem>>, vector<1x32xf32>
    %22 = vector.broadcast %21 : vector<1x32xf32> to vector<16x32xf32>
    %23 = arith.addf %20, %22 : vector<16x32xf32>
    %24 = math.tanh %23 : vector<16x32xf32>
    %25 = vector.shape_cast %24 : vector<16x32xf32> to vector<2x8x32xf32>
    %c0_16 = arith.constant 0 : index
    %c0_17 = arith.constant 0 : index
    %c0_18 = arith.constant 0 : index
    %26 = vector.load %arg2[%c0_16, %c0_17, %c0_18] : memref<2x1x32xf32, #tpu.memory_space<vmem>>, vector<2x1x32xf32>
    %27 = vector.broadcast %26 : vector<2x1x32xf32> to vector<2x8x32xf32>
    %28 = arith.addf %25, %27 : vector<2x8x32xf32>
    %c0_19 = arith.constant 0 : index
    %c0_20 = arith.constant 0 : index
    %c0_21 = arith.constant 0 : index
    %29 = vector.load %arg12[%c0_19, %c0_20, %c0_21] : memref<2x8x32xf32, #tpu.memory_space<vmem>>, vector<2x8x32xf32>
    tpu.vector_store %arg12[%c0_19, %c0_20, %c0_21], %28 {strides = array<i32>} : memref<2x8x32xf32, #tpu.memory_space<vmem>>, vector<2x8x32xf32>,
    %c0_22 = arith.constant 0 : index
    %c0_23 = arith.constant 0 : index
    %30 = vector.load %arg8[%c0_22, %c0_23] : memref<1x32xf32, #tpu.memory_space<vmem>>, vector<1x32xf32>
    %31 = vector.shape_cast %30 : vector<1x32xf32> to vector<1x1x32xf32>
    %32 = vector.broadcast %31 : vector<1x1x32xf32> to vector<2x8x32xf32>
    %33 = arith.mulf %28, %32 : vector<2x8x32xf32>
    %cst_24 = arith.constant dense<0.000000e+00> : vector<2x8xf32>
    %34 = vector.multi_reduction <add>, %33, %cst_24 [2] : vector<2x8x32xf32> to vector<2x8xf32>
    %c0_25 = arith.constant 0 : index
    %c0_26 = arith.constant 0 : index
    %35 = vector.load %arg9[%c0_25, %c0_26] : memref<1x1xf32, #tpu.memory_space<vmem>>, vector<1x1xf32>
    %36 = vector.broadcast %35 : vector<1x1xf32> to vector<2x8xf32>
    %37 = arith.addf %34, %36 : vector<2x8xf32>
    %cst_27 = arith.constant 0.000000e+00 : f32
    %38 = vector.broadcast %cst_27 : f32 to vector<2x8xf32>
    %39 = arith.maximumf %37, %38 : vector<2x8xf32>
    %cst_28 = arith.constant 1.000000e+00 : f32
    %40 = vector.broadcast %cst_28 : f32 to vector<2x8xf32>
    %41 = arith.addf %40, %39 : vector<2x8xf32>
    %c0_29 = arith.constant 0 : index
    %c0_30 = arith.constant 0 : index
    %42 = vector.load %arg10[%c0_29, %c0_30] : memref<2x1xf32, #tpu.memory_space<vmem>>, vector<2x1xf32>
    %43 = vector.broadcast %42 : vector<2x1xf32> to vector<2x8xf32>
    %44 = arith.divf %41, %43 : vector<2x8xf32>
    %c0_31 = arith.constant 0 : index
    %c0_32 = arith.constant 0 : index
    %45 = vector.load %arg13[%c0_31, %c0_32] : memref<2x8xf32, #tpu.memory_space<vmem>>, vector<2x8xf32>
    tpu.vector_store %arg13[%c0_31, %c0_32], %44 {strides = array<i32>} : memref<2x8xf32, #tpu.memory_space<vmem>>, vector<2x8xf32>,
    %c0_33 = arith.constant 0 : index
    %c0_34 = arith.constant 0 : index
    %46 = vector.load %arg11[%c0_33, %c0_34] : memref<2x8xf32, #tpu.memory_space<vmem>>, vector<2x8xf32>
    %47 = arith.mulf %44, %46 : vector<2x8xf32>
    %cst_35 = arith.constant 1.000000e+00 : f32
    %48 = vector.broadcast %cst_35 : f32 to vector<2x8xf32>
    %49 = arith.maximumf %47, %48 : vector<2x8xf32>
    %50 = math.roundeven %49 : vector<2x8xf32>
    %c0_36 = arith.constant 0 : index
    %c0_37 = arith.constant 0 : index
    %51 = vector.load %arg14[%c0_36, %c0_37] : memref<2x8xf32, #tpu.memory_space<vmem>>, vector<2x8xf32>
    tpu.vector_store %arg14[%c0_36, %c0_37], %50 {strides = array<i32>} : memref<2x8xf32, #tpu.memory_space<vmem>>, vector<2x8xf32>,
    return
  }
}

</mosaic_0001>

<bundles_post_ra>
// kernel: tpu_custom_call.1
= control target key start
LH: loop header
LB: loop body
LE: loop exit
PB: predicated region body
PF: predicated region fallthrough
CT: control target
= control target key end

     0   :  { %s797_s0 = inlined_call_operand.hbm [shape: f32[2,8,32], index: 0, kind: input, shape index: {}]   ;;  %s798_s1 = inlined_call_operand.vmem [shape: f32[2,8], index: 1, kind: input, shape index: {}]   ;;  %s799_s2 = inlined_call_operand.vmem [shape: f32[2,1,32], index: 2, kind: input, shape index: {}]   ;;  %s800_s3 = inlined_call_operand.hbm [shape: f32[1,32], index: 3, kind: input, shape index: {}]   ;;  %s801_s4 = inlined_call_operand.vmem [shape: f32[1,32], index: 4, kind: input, shape index: {}]   ;;  %s802_s5 = inlined_call_operand.hbm [shape: f32[32,32], index: 5, kind: input, shape index: {}]   ;;  %s803_s6 = inlined_call_operand.hbm [shape: f32[32,32], index: 6, kind: input, shape index: {}]   ;;  %s804_s7 = inlined_call_operand.vmem [shape: f32[1,32], index: 7, kind: input, shape index: {}]   ;;  %s805_s8 = inlined_call_operand.vmem [shape: f32[1,32], index: 8, kind: input, shape index: {}]   ;;  %s806_s9 = inlined_call_operand.<no memory space> [shape: f32[1,1], index: 9, kind: input, shape index: {}]   ;;  %s807_s10 = inlined_call_operand.vmem [shape: f32[2,1], index: 10, kind: input, shape index: {}]   ;;  %s808_s11 = inlined_call_operand.vmem [shape: f32[2,8], index: 11, kind: input, shape index: {}]   ;;  %s809_s12 = inlined_call_operand.hbm [shape: f32[2,8,32], index: 12, kind: output, shape index: {0}]   ;;  %s810_s13 = inlined_call_operand.hbm [shape: f32[2,8], index: 13, kind: output, shape index: {1}]   ;;  %s811_s14 = inlined_call_operand.hbm [shape: f32[2,8], index: 14, kind: output, shape index: {2}]  }
   0x1   :  { %v20_v0 = vstv %s806_s9 }
   0x2   :  { %21 = vst [vmem:[#allocation2] sm:$0x1] %v20_v0 }
   0x3   :  { %22 = vsyncpa [#allocation4], 0 }
   0x4   :  { %23 = vsyncpa [#allocation7], 0 }
   0x5   :  { %24 = vsyncpa [#allocation10], 0 }
   0x6   :  { %25 = vsyncpa [#allocation5], 0  ;;  %s49_s17 = sshll.u32 %s800_s3, 4  ;;  %s50_s17 = int_to_ptr.hbm [resolvable:$true] %s49_s17 }
   0x7   :  { %26 = vsyncpa [#allocation13], 0  ;;  %s632_s18 = smov [#allocation6]   ;;  %s31_s22 = sshll.u32 %s797_s0, 4  ;;  %s32_s22 = int_to_ptr.hbm [resolvable:$true] %s31_s22 }
   0x8   :  { %s51_s19 = sshll.u32 %s632_s18, 4  ;;  %s633_s9 = smov [#allocation3]   ;;  %s52_s19 = int_to_ptr.vmem [resolvable:$true] %s51_s19 }
   0x9   :  { %54 = dma.hbm_to_vmem [thread:$0]  %s50_s17, 16, %s52_s19, [#allocation7]  }
   0xa   :  { %s33_s23 = sshll.u32 %s633_s9, 4  ;;  %s634_s24 = smov 128   ;;  %s34_s23 = int_to_ptr.vmem [resolvable:$true] %s33_s23 }
   0xb   :  { %s635_s25 = smov 8   ;;  %s61_s27 = sshll.u32 %s802_s5, 4  ;;  %s62_s27 = int_to_ptr.hbm [resolvable:$true] %s61_s27 }
   0xc   :  { %39 = dma.hbm_to_vmem [thread:$0]  %s32_s22, 256, %s34_s23, [#allocation4], %s634_s24, %s634_s24, %s635_s25  }
   0xd   :  { %s636_s28 = smov [#allocation8]   ;;  %s74_s15 = sshll.u32 %s803_s6, 4  ;;  %s75_s15 = int_to_ptr.hbm [resolvable:$true] %s74_s15 }
   0xe   :  { %s63_s29 = sshll.u32 %s636_s28, 4  ;;  %s637_s16 = smov [#allocation9]   ;;  %s64_s29 = int_to_ptr.vmem [resolvable:$true] %s63_s29 }
   0xf   :  { %69 = dma.hbm_to_vmem [thread:$0]  %s62_s27, 512, %s64_s29, [#allocation7], %s634_s24, %s634_s24, %s635_s25  }
  0x10   :  { %s76_s17 = sshll.u32 %s637_s16, 4  ;;  %s77_s17 = int_to_ptr.vmem [resolvable:$true] %s76_s17 }
  0x11   :  { %82 = dma.hbm_to_vmem [thread:$0]  %s75_s15, 512, %s77_s17, [#allocation10], %s634_s24, %s634_s24, %s635_s25  }
  0x12   :  { %622 = dma.done.wait [#allocation4], 256  }
  0x13   :  { %623 = vsyncadd [#allocation4], 4294967040 }
  0x14   :  { %624 = dma.done.wait [#allocation7], 528  }
  0x15   :  { %625 = vsyncadd [#allocation7], 4294966768 }
  0x16   :  { %626 = dma.done.wait [#allocation10], 512  }
  0x17   :  { %627 = vsyncadd [#allocation10], 4294966784  ;;  %v113_v1 = vlaneseq  ;;  %v111_v3 = vld [vmem:[%s798_s1] sm:$0x3]  ;;  %v147_v4 = vld [vmem:[#allocation9 + $0x18] sm:$0xff]  ;;  %vm148_vm0 = vcmask 261120  }
  0x18   :  { %v119_v5 = vperm.slane %v111_v3, 1  ;;  %401 = vmatpush.msra.mxu2 %v147_v4  ;;  %v143_v6 = vld [vmem:[#allocation8 + $0x18] sm:$0xff]  ;;  %167 = vmatpush.msra.mxu0 %v147_v4  ;;  %v112_v7 = vperm.slane %v111_v3, 0  ;;  %v308_v8 = vld [vmem:[%s808_s11] sm:$0x3]  ;;  %v146_v11 = vld [vmem:[#allocation9 + $0x10] sm:$0xff] }
  0x19   :  { %v114_v2 = vshrl.u32 %v113_v1, 7  ;;  %405 = vmatpush.msra.mxu3 %v143_v6  ;;  %196 = vmatpush.msra.mxu1 %v143_v6  ;;  %v310_v9 = vperm.slane %v308_v8, 0  ;;  %v317_v10 = vperm.slane %v308_v8, 1  ;;  %v142_v12 = vld [vmem:[#allocation8 + $0x10] sm:$0xff]  ;;  %v145_v13 = vld [vmem:[#allocation9 + $0x8] sm:$0xff]  ;;  %v144_v15 = vld [vmem:[#allocation9] sm:$0xff] }
  0x1a   :  { %402 = vmatpush.msra.mxu2 %v146_v11  ;;  %v141_v14 = vld [vmem:[#allocation8 + $0x8] sm:$0xff]  ;;  %168 = vmatpush.msra.mxu0 %v146_v11  ;;  %v140_v16 = vld [vmem:[#allocation8] sm:$0xff]  ;;  %v110_v17 = vld [vmem:[#allocation3 + $0x8] sm:$0xff]  ;;  %v638_v20 = vmov 0   ;;  %s351_s29 = sshll.u32 %s809_s12, 4  ;;  %s640_s12 = smov [#allocation12]   ;;  %s352_s29 = int_to_ptr.hbm [resolvable:$true] %s351_s29 }
  0x1b   :  { %435 = vset.pattern.permute.xlu0 %v114_v2  ;;  %406 = vmatpush.msra.mxu3 %v142_v12  ;;  %v109_v18 = vld [vmem:[#allocation3] sm:$0xff]  ;;  %v439_v21 = vld [vmem:[#allocation6] ss:$0 sm:$0xff]  ;;  %v440_v22 = vld [vmem:[%s801_s4] ss:$0 sm:$0xff]  ;;  %s363_s0 = sshll.u32 %s640_s12, 4  ;;  %s364_s0 = int_to_ptr.vmem [resolvable:$true] %s363_s0 }
  0x1c   :  { %197 = vmatpush.msra.mxu1 %v142_v12  ;;  %403 = vmatpush.msra.mxu2 %v145_v13  ;;  %v252_v19 = vld [vmem:[%s807_s10] sm:$0x3]  ;;  %vm303_vm11 = vcmask 1041409   ;;  %vm306_vm12 = vcmask 58368   ;;  %s641_s15 = smov [#allocation14]   ;;  %s376_s6 = sshll.u32 %s811_s14, 4  ;;  %s377_s6 = int_to_ptr.hbm [resolvable:$true] %s376_s6 }
  0x1d   :  { %407 = vmatpush.msra.mxu3 %v141_v14  ;;  %169 = vmatpush.msra.mxu0 %v145_v13  ;;  %v441_v32 = vld [vmem:[%s804_s7] ss:$0 sm:$0xff]  ;;  %v442_v40 = vld [vmem:[%s799_s2 + $0x1] ss:$0 sm:$0xff]  ;;  %s374_s16 = sshll.u32 %s641_s15, 4  ;;  %s375_s16 = int_to_ptr.vmem [resolvable:$true] %s374_s16 }
  0x1e   :  { %198 = vmatpush.msra.mxu1 %v141_v14  ;;  %404 = vmatpush.msra.mxu2 %v144_v15  ;;  %v443_v41 = vld [vmem:[%s805_s8] ss:$0 sm:$0xff] }
  0x1f   :  { %408 = vmatpush.msra.mxu3 %v140_v16  ;;  %170 = vmatpush.msra.mxu0 %v144_v15  ;;  %v444_v42 = vld [vmem:[%s799_s2] ss:$0 sm:$0xff]  ;;  %s639_s2 = smov [#allocation11]  }
  0x20   :  { %400 = vmatmul.msk.f32.vlgmr.msra.gmra.mxu3 %vm148_vm0, %v110_v17  ;;  %199 = vmatpush.msra.mxu1 %v140_v16  ;;  %v445_v51 = vld [vmem:[#allocation2] ss:$0 sm:$0xff]  ;;  %s349_s7 = sshll.u32 %s639_s2, 4  ;;  %s350_s7 = int_to_ptr.vmem [resolvable:$true] %s349_s7 }
  0x21   :  { %399 = vmatmul.msk.f32.vlgmr.msra.gmra.mxu1 %vm148_vm0, %v109_v18  ;;  %436 = vset.pattern.permute.xlu1 %v638_v20 }
  0x22   :  { %437 = vset.pattern.permute.xlu2 %v638_v20  ;;  %255 = vperm.xlu1 %436, %v252_v19  }
  0x23   :  { %124 = vperm.xlu0 %435, %v119_v5  }
  0x2b   :  { %117 = vperm.xlu0 %435, %v112_v7  }
  0x33   :  { %315 = vperm.xlu0 %435, %v310_v9  }
  0x3b   :  { %322 = vperm.xlu0 %435, %v317_v10  }
  0x43   :  { %438 = vset.pattern.permute.xlu0 %v638_v20 }
  0x94   :  { %v256_v52 = vpop.permute.xlu1 %255 }
  0x95   :  { %v125_v23 = vpop.permute.xlu0 %124  ;;  %v258_v53 = vperm.slane %v256_v52, 1  ;;  %v257_v54 = vperm.slane %v256_v52, 0 }
  0x96   :  { %v131_v24 = vmul.f32 %v439_v21, %v125_v23 }
  0x97   :  { %vm281_vm1 = vweird.f32 %v258_v53  ;;  %vm266_vm3 = vweird.f32 %v257_v54  ;;  %v285_v3 = vand.u32 2147483647, %v258_v53  ;;  %v287_v4 = vand.u32 2147483648, %v258_v53 }
  0x98   :  { %v137_v25 = vadd.f32 %v440_v22, %v131_v24  ;;  %v272_v5 = vand.u32 2147483648, %v257_v54  ;;  %v270_v8 = vand.u32 2147483647, %v257_v54 }
  0x99   :  { %vm286_vm7 = vcmp.eq.f32.partialorder %v285_v3, 8.507059e+37  ;;  %v288_v14 = vor.u32 1.1754944e-38, %v287_v4 }
  0x9a   :  { %v139_v26 = vmax.f32 %v137_v25, 0.0  ;;  %v273_v15 = vor.u32 1.1754944e-38, %v272_v5  ;;  %vm271_vm8 = vcmp.eq.f32.partialorder %v270_v8, 8.507059e+37 }
  0x9c   :  { %398 = vmatmul.msk.f32.vlgmr.msra.gmra.mxu2 %vm148_vm0, %v139_v26 }
  0x9d   :  { %v118_v27 = vpop.permute.xlu0 %117 }
  0x9e   :  { %v130_v28 = vmul.f32 %v439_v21, %v118_v27  ;;  %v201_v34 = vpop.f32.mrf.mxu1 }
  0xa0   :  { %v136_v29 = vadd.f32 %v440_v22, %v130_v28 }
  0xa2   :  { %v138_v30 = vmax.f32 %v136_v29, 0.0 }
  0xa3   :  { %v204_v31 = vpop.f32.mrf.mxu3 }
  0xa4   :  { %397 = vmatmul.msk.f32.vlgmr.msra.gmra.mxu0 %vm148_vm0, %v138_v30 }
  0xa5   :  { %v316_v0 = vpop.permute.xlu0 %315 }
  0xad   :  { %v323_v25 = vpop.permute.xlu0 %322 }
 0x11f   :  { %v175_v33 = vpop.f32.mrf.mxu2 }
 0x120   :  { %v205_v35 = vadd.f32 %v204_v31, %v175_v33 }
 0x121   :  { %v172_v36 = vpop.f32.mrf.mxu0 }
 0x122   :  { %v212_v37 = vadd.f32 %v441_v32, %v205_v35  ;;  %v202_v38 = vadd.f32 %v201_v34, %v172_v36 }
 0x124   :  { %446 = vtanh.f32 %v212_v37  ;;  %v211_v39 = vadd.f32 %v441_v32, %v202_v38 }
 0x126   :  { %448 = vtanh.f32 %v211_v39 }
 0x127   :  { %450 = vrcp.f32 %v258_v53 }
 0x128   :  { %452 = vrcp.f32 %v257_v54 }
 0x12a   :  { %v447_v43 = vpop.eup %446 }
 0x12b   :  { %v224_v44 = vadd.f32 %v447_v43, %v442_v40 }
 0x12c   :  { %v449_v45 = vpop.eup %448 }
 0x12d   :  { %v232_v46 = vmul.f32 %v443_v41, %v224_v44  ;;  %226 = vst.msk [vmem:[#allocation11 + $0x8] sm:$0xff] %vm148_vm0, %v224_v44  ;;  %v223_v47 = vadd.f32 %v449_v45, %v444_v42  ;;  %v451_v55 = vpop.eup %450  ;;  %v300_v44 = vand.u32 127, %v113_v1 }
 0x12e   :  { %v453_v56 = vpop.eup %452  ;;  %v277_v57 = vmul.f32 %v451_v55, %v258_v53  ;;  %vm282_vm2 = vweird.f32 %v451_v55 }
 0x12f   :  { %v236_v48 = vsel %vm148_vm0, %v232_v46, 0.0  ;;  %v231_v49 = vmul.f32 %v443_v41, %v223_v47  ;;  %225 = vst.msk [vmem:[#allocation11] sm:$0xff] %vm148_vm0, %v223_v47  ;;  %v262_v58 = vmul.f32 %v453_v56, %v257_v54  ;;  %vm267_vm4 = vweird.f32 %v453_v56  ;;  %vm774_vm5 = vmor %vm281_vm1, %vm282_vm2 }
 0x130   :  { %237 = vadd.xlane.f32.xlu2 %v236_v48  ;;  %v278_v59 = vsub.f32 1.0, %v277_v57  ;;  %vm268_vm6 = vmor %vm266_vm3, %vm267_vm4  ;;  %357 = dma.vmem_to_hbm [thread:$0]  %s350_s7, 256, %s352_s29, [#allocation5], %s634_s24, %s634_s24, %s635_s25  }
 0x131   :  { %v233_v50 = vsel %vm148_vm0, %v231_v49, 0.0  ;;  %v263_v60 = vsub.f32 1.0, %v262_v58  ;;  %s365_s25 = sshll.u32 %s810_s13, 4  ;;  %s366_s25 = int_to_ptr.hbm [resolvable:$true] %s365_s25 }
 0x132   :  { %234 = vadd.xlane.f32.xlu1 %v233_v50  ;;  %v279_v62 = vmul.f32 %v451_v55, %v278_v59 }
 0x133   :  { %v264_v63 = vmul.f32 %v453_v56, %v263_v60 }
 0x134   :  { %v280_v2 = vadd.f32 %v451_v55, %v279_v62 }
 0x135   :  { %v265_v7 = vadd.f32 %v453_v56, %v264_v63 }
 0x136   :  { %v284_v13 = vsel %vm774_vm5, %v451_v55, %v280_v2 }
 0x137   :  { %v269_v18 = vsel %vm268_vm6, %v453_v56, %v265_v7  ;;  %v289_v21 = vsel %vm286_vm7, %v288_v14, %v284_v13 }
 0x138   :  { %v274_v22 = vsel %vm271_vm8, %v273_v15, %v269_v18 }
 0x148   :  { %243 = vperm.xlu2 %437, %v445_v51  }
 0x1a3   :  { %v238_v61 = vpop.xlane.xlu2 %237 }
 0x1a5   :  { %v235_v9 = vpop.xlane.xlu1 %234 }
 0x1ab   :  { %v244_v10 = vpop.permute.xlu2 %243 }
 0x1ac   :  { %v246_v11 = vadd.f32 %v244_v10, %v235_v9  ;;  %v247_v12 = vadd.f32 %v244_v10, %v238_v61 }
 0x1ae   :  { %v248_v16 = vmax.f32 %v246_v11, 0.0  ;;  %v249_v17 = vmax.f32 %v247_v12, 0.0 }
 0x1b0   :  { %v250_v19 = vadd.f32 1.0, %v248_v16  ;;  %v251_v20 = vadd.f32 1.0, %v249_v17 }
 0x1b2   :  { %v290_v23 = vmul.f32 %v289_v21, %v251_v20  ;;  %v275_v24 = vmul.f32 %v274_v22, %v250_v19 }
 0x1b4   :  { %297 = vperm.xlu2 %437, %v290_v23   ;;  %v327_v26 = vmul.f32 %v323_v25, %v290_v23  ;;  %294 = vperm.xlu0 %438, %v275_v24   ;;  %v326_v27 = vmul.f32 %v316_v0, %v275_v24 }
 0x1b6   :  { %v329_v28 = vmax.f32 %v327_v26, 1.0  ;;  %v328_v29 = vmax.f32 %v326_v27, 1.0 }
 0x1b8   :  { %v419_v30 = vcvt.f32.s32 %v329_v28  ;;  %v411_v31 = vcvt.f32.s32 %v328_v29  ;;  %v417_v33 = vand.u32 2147483647, %v329_v28  ;;  %v422_v36 = vand.u32 2147483648, %v329_v28 }
 0x1b9   :  { %v409_v37 = vand.u32 2147483647, %v328_v29  ;;  %v414_v39 = vand.u32 2147483648, %v328_v29 }
 0x1ba   :  { %v420_v32 = vcvt.s32.f32 %v419_v30  ;;  %v412_v34 = vcvt.s32.f32 %v411_v31  ;;  %vm418_vm9 = vcmp.lt.f32.partialorder %v417_v33, 8388608.0 }
 0x1bb   :  { %vm410_vm10 = vcmp.lt.f32.partialorder %v409_v37, 8388608.0 }
 0x1bc   :  { %v421_v35 = vand.u32 2147483647, %v420_v32  ;;  %v413_v38 = vand.u32 2147483647, %v412_v34 }
 0x1be   :  { %v423_v40 = vor.u32 %v422_v36, %v421_v35  ;;  %v415_v41 = vor.u32 %v414_v39, %v413_v38 }
 0x1c0   :  { %v424_v42 = vsel %vm418_vm9, %v423_v40, %v329_v28  ;;  %v416_v43 = vsel %vm410_vm10, %v415_v41, %v328_v29 }
 0x1c1   :  { %338 = vperm.xlu0 %438, %v424_v42   ;;  %335 = vperm.xlu2 %437, %v416_v43  }
 0x20e   :  { %v298_v45 = vpop.permute.xlu2 %297 }
 0x20f   :  { %v302_v47 = vperm.slane %v298_v45, %v300_v44 }
 0x21b   :  { %v336_v1 = vpop.permute.xlu2 %335 }
 0x21c   :  { %v340_v51 = vperm.slane %v336_v1, %v300_v44 }
 0x226   :  { %v295_v46 = vpop.permute.xlu0 %294 }
 0x227   :  { %v301_v48 = vperm.slane %v295_v46, %v300_v44 }
 0x229   :  { %v304_v49 = vsel %vm303_vm11, %v302_v47, %v301_v48 }
 0x22a   :  { %307 = vst.msk [vmem:[#allocation12] sm:$0x3] %vm306_vm12, %v304_v49 }
 0x22b   :  { %368 = dma.vmem_to_hbm [thread:$0]  %s364_s0, 32, %s366_s25, [#allocation13]  }
 0x233   :  { %v339_v50 = vpop.permute.xlu0 %338 }
 0x234   :  { %v341_v52 = vperm.slane %v339_v50, %v300_v44 }
 0x236   :  { %v342_v53 = vsel %vm303_vm11, %v341_v52, %v340_v51 }
 0x237   :  { %344 = vst.msk [vmem:[#allocation14] sm:$0x3] %vm306_vm12, %v342_v53 }
 0x238   :  { %379 = dma.vmem_to_hbm [thread:$0]  %s375_s16, 32, %s377_s6, [#allocation13]  }
 0x239   :  { %628 = dma.done.wait [#allocation5], 256  }
 0x23a   :  { %629 = vsyncadd [#allocation5], 4294967040 }
 0x23b   :  { %630 = dma.done.wait [#allocation13], 64  }
 0x23c   :  { %631 = vsyncadd [#allocation13], 4294967232 }
 0x23d   :  { %392 = vsyncpa [#allocation4], 1 }
 0x23e   :  { %393 = vsyncpa [#allocation7], 1 }
 0x23f   :  { %394 = vsyncpa [#allocation10], 1 }
 0x240   :  { %395 = vsyncpa [#allocation5], 1 }
 0x241   :  { %396 = vsyncpa [#allocation13], 1 }

</bundles_post_ra>
